<compile_context>
chip_gen: v5e
topology: v5e:2x2
jax: 0.10.0
libtpu: 0.0.40
codegen_flags: <defaults>
</compile_context>

<pallas_src>
import jax
import jax.numpy as jnp
from jax import lax
from jax.experimental import pallas as pl
from jax.experimental.pallas import tpu as pltpu


def _round_up(x, m):
    return ((x + m - 1) // m) * m


def _cdiv(a, b):
    return (a + b - 1) // b


# ---------------------------------------------------------------------------
# 1. Linear projection kernel:  out = x @ W.T   (W stored [out, in], torch layout)
# ---------------------------------------------------------------------------
def _linear_kernel(x_ref, w_ref, o_ref):
    # Contract the feature (last) axis of both operands -> x @ W.T, no transpose needed.
    o_ref[...] = lax.dot_general(
        x_ref[...], w_ref[...], (((1,), (1,)), ((), ())),
        preferred_element_type=jnp.float32,
    ).astype(o_ref.dtype)


def _project(x, w, rows_padded, din_padded, dout_padded, row_tile, compute_dtype):
    """x: [S, Din] @ w[Dout, Din].T -> [rows_padded, dout_padded] in compute_dtype."""
    S, Din = x.shape
    Dout = w.shape[0]
    xp = jnp.pad(x, ((0, rows_padded - S), (0, din_padded - Din))).astype(compute_dtype)
    wp = jnp.pad(w, ((0, dout_padded - Dout), (0, din_padded - Din))).astype(compute_dtype)
    # The full (padded) weight is one resident block (fine for these feature dims);
    # for very large Dout/Din add grid axes over dout / din instead.
    return pl.pallas_call(
        _linear_kernel,
        out_shape=jax.ShapeDtypeStruct((rows_padded, dout_padded), compute_dtype),
        grid_spec=pltpu.PrefetchScalarGridSpec(
            num_scalar_prefetch=0,
            grid=(rows_padded // row_tile,),
            in_specs=[
                pl.BlockSpec((row_tile, din_padded), lambda i: (i, 0)),
                pl.BlockSpec((dout_padded, din_padded), lambda i: (0, 0)),
            ],
            out_specs=pl.BlockSpec((row_tile, dout_padded), lambda i: (i, 0)),
        ),
        compiler_params=pltpu.CompilerParams(
            dimension_semantics=("parallel",),
            vmem_limit_bytes=40 * 1024 * 1024,
        ),
    )(xp, wp)


# ---------------------------------------------------------------------------
# 2. Flash attention kernel over the projected Q/K/V (NO 1/sqrt(d) scaling).
# ---------------------------------------------------------------------------
def _flash_kernel(q_ref, k_ref, v_ref, bias_ref, o_ref, m_sc, l_sc, acc_sc):
    kv = pl.program_id(1)

    @pl.when(kv == 0)
    def _init():
        m_sc[...] = jnp.full(m_sc.shape, -jnp.inf, m_sc.dtype)
        l_sc[...] = jnp.zeros(l_sc.shape, l_sc.dtype)
        acc_sc[...] = jnp.zeros(acc_sc.shape, acc_sc.dtype)

    # scores = Q @ K^T : contract the feature axis of both bf16 tiles on the MXU.
    s = lax.dot_general(q_ref[...], k_ref[...], (((1,), (1,)), ((), ())),
                        preferred_element_type=jnp.float32)
    # additive key-padding bias row: 0 for real keys, -1e30 for padded key columns
    # (finite value avoids any inf-inf NaN risk; single VPU add per element).
    s = s + bias_ref[...]

    # online softmax update
    m_new = jnp.maximum(m_sc[...], jnp.max(s, axis=-1, keepdims=True))
    alpha = jnp.exp(m_sc[...] - m_new)
    p = jnp.exp(s - m_new)
    l_sc[...] = alpha * l_sc[...] + jnp.sum(p, axis=-1, keepdims=True)
    acc_sc[...] = alpha * acc_sc[...] + jnp.dot(
        p.astype(v_ref.dtype), v_ref[...], preferred_element_type=jnp.float32)
    m_sc[...] = m_new

    @pl.when(kv == pl.num_programs(1) - 1)
    def _finalize():
        inv_l = pl.reciprocal(l_sc[...], approx=True)
        o_ref[...] = (acc_sc[...] * inv_l).astype(o_ref.dtype)


def attention(query, key, value, w_q, w_k, w_v, *, tq=512, tk=128,
              compute_dtype=jnp.bfloat16):
    """query: [Sq, Dq], key: [Sk, Dk], value: [Sk, Dv]
       w_q: [Do, Dq], w_k: [Do, Dk], w_v: [Dvo, Dv]  (torch nn.Linear [out, in] layout)
       returns softmax((q @ w_q.T) @ (k @ w_k.T).T) @ (v @ w_v.T) : [Sq, Dvo]
    """
    Sq, Dq = query.shape
    Sk, Dk = key.shape
    Skv, Dv = value.shape
    assert Sk == Skv
    Do = w_q.shape[0]
    Dvo = w_v.shape[0]
    assert w_q.shape == (Do, Dq) and w_k.shape == (Do, Dk) and w_v.shape == (Dvo, Dv)
    out_dtype = query.dtype

    # Lane-dense padded feature dims (multiples of 128).
    DqP, DkP, DvP = (_round_up(d, 128) for d in (Dq, Dk, Dv))
    DoP, DvoP = _round_up(Do, 128), _round_up(Dvo, 128)

    # Tile sizes: tq multiple of 16 (bf16 sublane packing), shrunk so >=2 q tiles exist
    # when Sq allows it (v7x megacore); tk kept a multiple of 128 (lane / MXU width).
    tq = _round_up(tq, 16)
    tq = min(tq, _round_up(Sq, 16))
    if Sq > 16:
        tq = min(tq, _round_up(_cdiv(Sq, 2), 16))
    tk = _round_up(tk, 128)
    tk = min(tk, _round_up(Sk, 128))
    SqP = _round_up(Sq, tq)
    SkP = _round_up(Sk, tk)
    nq, nk = SqP // tq, SkP // tk

    # Q/K/V projections hoisted out of the flash loop (one tiled matmul each, bf16 out).
    qp = _project(query, w_q, SqP, DqP, DoP, tq, compute_dtype)   # [SqP, DoP]
    kp = _project(key, w_k, SkP, DkP, DoP, tk, compute_dtype)     # [SkP, DoP]
    vp = _project(value, w_v, SkP, DvP, DvoP, tk, compute_dtype)  # [SkP, DvoP]

    # Precomputed key-padding bias row (0 for valid keys, -1e30 for padded columns).
    col = jnp.arange(SkP, dtype=jnp.int32)
    bias = jnp.where(col < Sk, 0.0, -1e30).astype(jnp.float32).reshape(1, SkP)

    out_p = pl.pallas_call(
        _flash_kernel,
        out_shape=jax.ShapeDtypeStruct((SqP, DvoP), out_dtype),
        grid_spec=pltpu.PrefetchScalarGridSpec(
            num_scalar_prefetch=0,
            grid=(nq, nk),
            in_specs=[
                pl.BlockSpec((tq, DoP), lambda i, j: (i, 0)),    # projected Q tile
                pl.BlockSpec((tk, DoP), lambda i, j: (j, 0)),    # projected K tile
                pl.BlockSpec((tk, DvoP), lambda i, j: (j, 0)),   # projected V tile
                pl.BlockSpec((1, tk), lambda i, j: (0, j)),      # key-padding bias row
            ],
            out_specs=pl.BlockSpec((tq, DvoP), lambda i, j: (i, 0)),
            scratch_shapes=[
                pltpu.VMEM((tq, 1), jnp.float32),     # running max   m
                pltpu.VMEM((tq, 1), jnp.float32),     # running denom l
                pltpu.VMEM((tq, DvoP), jnp.float32),  # output accumulator
            ],
        ),
        compiler_params=pltpu.CompilerParams(
            dimension_semantics=("parallel", "arbitrary"),
            vmem_limit_bytes=40 * 1024 * 1024,  # <= ~40 MiB: safe on v7x's 64 MiB/TC
        ),
    )(qp, kp, vp, bias)

    return out_p[:Sq, :Dvo]


# ---------------------------------------------------------------------------
# References for the self-test.
# ---------------------------------------------------------------------------
def _ref_f32(query, key, value, w_q, w_k, w_v):
    """Pure f32 reference of the PyTorch module (HIGHEST-precision dots)."""
    hp = jax.lax.Precision.HIGHEST
    Q = jnp.dot(query, w_q.T, precision=hp)
    K = jnp.dot(key, w_k.T, precision=hp)
    V = jnp.dot(value, w_v.T, precision=hp)
    s = jnp.dot(Q, K.T, precision=hp)
    return jnp.dot(jax.nn.softmax(s, axis=-1), V, precision=hp)


def _ref_bf16(query, key, value, w_q, w_k, w_v, cd=jnp.bfloat16):
    """Same math, but with the kernel's quantization: bf16 MXU operands, f32 accumulate."""
    dot = lambda a, b: jnp.dot(a.astype(cd), b.astype(cd),
                               preferred_element_type=jnp.float32)
    Q, K, V = dot(query, w_q.T), dot(key, w_k.T), dot(value, w_v.T)
    s = dot(Q, K.T)
    p = jnp.exp(s - jnp.max(s, axis=-1, keepdims=True))
    return dot(p, V) / jnp.sum(p, axis=-1, keepdims=True)


if __name__ == "__main__":
    def run_case(name, seed, Sq, Sk, qd, kd, vd, **kw):
        ks = jax.random.split(jax.random.PRNGKey(seed), 6)
        query = jax.random.normal(ks[0], (Sq, qd), dtype=jnp.float32)
        key = jax.random.normal(ks[1], (Sk, kd), dtype=jnp.float32)
        value = jax.random.normal(ks[2], (Sk, vd), dtype=jnp.float32)
        w_q = jax.random.normal(ks[3], (qd, qd), dtype=jnp.float32) * 0.05
        w_k = jax.random.normal(ks[4], (qd, kd), dtype=jnp.float32) * 0.05
        w_v = jax.random.normal(ks[5], (vd, vd), dtype=jnp.float32) * 0.05

        out = jax.block_until_ready(attention(query, key, value, w_q, w_k, w_v, **kw))
        ref32 = _ref_f32(query, key, value, w_q, w_k, w_v)
        refbf = _ref_bf16(query, key, value, w_q, w_k, w_v)

        assert out.shape == (Sq, vd), f"{name}: bad shape {out.shape}"
        assert bool(jnp.all(jnp.isfinite(out))), f"{name}: non-finite output"
        assert jnp.allclose(out, refbf, atol=1e-2, rtol=1e-2), \
            f"{name}: mismatch vs bf16-quantized reference"
        assert jnp.allclose(out, ref32, atol=5e-2, rtol=5e-2), \
            f"{name}: mismatch vs f32 reference"

    # 0) spec-like shapes: single query/key/value row, dim 3 (heavy padding path).
    run_case("spec", 0, Sq=1, Sk=1, qd=3, kd=3, vd=3)
    # 1) small square case: seq=8, dims=16 (single tile along both grid axes).
    run_case("small", 0, Sq=8, Sk=8, qd=16, kd=16, vd=16)
    # 2) ragged case: 2 q tiles (megacore split), 3 kv tiles + key padding mask.
    run_case("ragged", 1, Sq=72, Sk=300, qd=16, kd=24, vd=48)

    print("KERNEL_OK")
</pallas_src>

<mosaic_0001>
module attributes {stable_mosaic.version = 11 : i64} {
  func.func @_linear_kernel(%arg0: i32, %arg1: memref<16x128xbf16, #tpu.memory_space<vmem>>, %arg2: memref<128x128xbf16, #tpu.memory_space<vmem>>, %arg3: memref<16x128xbf16, #tpu.memory_space<vmem>>) attributes {dimension_semantics = [#tpu.dimension_semantics<parallel>], iteration_bounds = array<i64: 1>, scalar_prefetch = 0 : i64, scratch_operands = 0 : i64, tpu.core_type = #tpu.core_type<tc>, window_params = [{transform_indices = @transform_0, window_bounds = array<i64: 16, 128>}, {pipeline_mode = #tpu.pipeline_mode<synchronous>, transform_indices = @transform_1, window_bounds = array<i64: 128, 128>}, {transform_indices = @transform_2, window_bounds = array<i64: 16, 128>}]} {
    %c0 = arith.constant 0 : index
    %c0_0 = arith.constant 0 : index
    %0 = vector.load %arg1[%c0, %c0_0] : memref<16x128xbf16, #tpu.memory_space<vmem>>, vector<16x128xbf16>
    %c0_1 = arith.constant 0 : index
    %c0_2 = arith.constant 0 : index
    %1 = vector.load %arg2[%c0_1, %c0_2] : memref<128x128xbf16, #tpu.memory_space<vmem>>, vector<128x128xbf16>
    %cst = arith.constant dense<0.000000e+00> : vector<16x128xf32>
    %2 = tpu.matmul %0, %1, %cst {dimension_numbers = #tpu.dot_dimension_numbers<[1], [1], [0], [0], [0, 0, 1, 0], [], []>} : vector<16x128xbf16>, vector<128x128xbf16>, vector<16x128xf32> -> vector<16x128xf32>
    %3 = arith.truncf %2 : vector<16x128xf32> to vector<16x128xbf16>
    %c0_3 = arith.constant 0 : index
    %c0_4 = arith.constant 0 : index
    %4 = vector.load %arg3[%c0_3, %c0_4] : memref<16x128xbf16, #tpu.memory_space<vmem>>, vector<16x128xbf16>
    tpu.vector_store %arg3[%c0_3, %c0_4], %3 {strides = array<i32>} : memref<16x128xbf16, #tpu.memory_space<vmem>>, vector<16x128xbf16>,
    return
  }
  func.func @transform_0(%arg0: i32) -> (i32, i32) {
    %c0_i32 = arith.constant 0 : i32
    %c0_i32_0 = arith.constant 0 : i32
    return %arg0, %c0_i32 : i32, i32
  }
  func.func @transform_1(%arg0: i32) -> (i32, i32) {
    %c0_i32 = arith.constant 0 : i32
    %c0_i32_0 = arith.constant 0 : i32
    %c0_i32_1 = arith.constant 0 : i32
    return %c0_i32, %c0_i32_0 : i32, i32
  }
  func.func @transform_2(%arg0: i32) -> (i32, i32) {
    %c0_i32 = arith.constant 0 : i32
    %c0_i32_0 = arith.constant 0 : i32
    return %arg0, %c0_i32 : i32, i32
  }
}

</mosaic_0001>

<bundles_post_ra>
// kernel: tpu_custom_call.1
= control target key start
LH: loop header
LB: loop body
LE: loop exit
PB: predicated region body
PF: predicated region fallthrough
CT: control target
= control target key end

     0   :  { %7 = vsyncpa [#allocation3], 0  ;;  %s325_s0 = inlined_call_operand.hbm [shape: bf16[16,128], index: 0, kind: input, shape index: {}]   ;;  %s326_s1 = inlined_call_operand.hbm [shape: bf16[128,128], index: 1, kind: input, shape index: {}]   ;;  %s327_s2 = inlined_call_operand.hbm [shape: bf16[16,128], index: 2, kind: output, shape index: {}]  }
   0x1   :  { %8 = vsyncpa [#allocation6], 0 }
   0x2   :  { %9 = vsyncpa [#allocation4], 0  ;;  %s14_s11 = sshll.u32 %s325_s0, 4  ;;  %s287_s12 = smov [#allocation2]   ;;  %s15_s11 = int_to_ptr.hbm [resolvable:$true] %s14_s11 }
   0x3   :  { %s16_s13 = sshll.u32 %s287_s12, 4  ;;  %s27_s16 = sshll.u32 %s326_s1, 4  ;;  %s17_s13 = int_to_ptr.vmem [resolvable:$true] %s16_s13  ;;  %s28_s16 = int_to_ptr.hbm [resolvable:$true] %s27_s16 }
   0x4   :  { %s288_s17 = smov 64   ;;  %s289_s18 = smov 4  }
   0x5   :  { %22 = dma.hbm_to_vmem [thread:$0]  %s15_s11, 128, %s17_s13, [#allocation3], %s288_s17, %s288_s17, %s289_s18  }
   0x6   :  { %s290_s19 = smov [#allocation5]  }
   0x7   :  { %s29_s20 = sshll.u32 %s290_s19, 4  ;;  %s30_s20 = int_to_ptr.vmem [resolvable:$true] %s29_s20 }
   0x8   :  { %35 = dma.hbm_to_vmem [thread:$0]  %s28_s16, 1024, %s30_s20, [#allocation6], %s288_s17, %s288_s17, %s289_s18  }
   0x9   :  { %281 = dma.done.wait [#allocation3], 128  }
   0xa   :  { %282 = vsyncadd [#allocation3], 4294967168 }
   0xb   :  { %283 = dma.done.wait [#allocation6], 1024  }
   0xc   :  { %284 = vsyncadd [#allocation6], 4294966272  ;;  %v198_v0 = vld [vmem:[#allocation5 + $0x38] sm:$0xff]  ;;  %v197_v1 = vld [vmem:[#allocation5 + $0x30] sm:$0xff]  ;;  %s291_s0 = smov [#allocation7]   ;;  %s140_s23 = sshll.u32 %s327_s2, 4  ;;  %s141_s23 = int_to_ptr.hbm [resolvable:$true] %s140_s23 }
   0xd   :  { %116 = vmatpush.bf16.xpose.msra.mxu0 %v198_v0  ;;  %v196_v2 = vld [vmem:[#allocation5 + $0x28] sm:$0xff]  ;;  %v195_v3 = vld [vmem:[#allocation5 + $0x20] sm:$0xff]  ;;  %v194_v4 = vld [vmem:[#allocation5 + $0x18] sm:$0xff]  ;;  %s138_s1 = sshll.u32 %s291_s0, 4  ;;  %s139_s1 = int_to_ptr.vmem [resolvable:$true] %s138_s1 }
   0xe   :  { %v193_v5 = vld [vmem:[#allocation5 + $0x10] sm:$0xff]  ;;  %v192_v6 = vld [vmem:[#allocation5 + $0x8] sm:$0xff]  ;;  %v191_v7 = vld [vmem:[#allocation5] sm:$0xff] }
   0xf   :  { %v190_v8 = vld [vmem:[#allocation2] sm:$0xff] }
  0x15   :  { %117 = vmatpush.bf16.xpose.msra.mxu0 %v197_v1 }
  0x1d   :  { %118 = vmatpush.bf16.xpose.msra.mxu0 %v196_v2 }
  0x25   :  { %119 = vmatpush.bf16.xpose.msra.mxu0 %v195_v3 }
  0x2d   :  { %120 = vmatpush.bf16.xpose.msra.mxu0 %v194_v4 }
  0x35   :  { %121 = vmatpush.bf16.xpose.msra.mxu0 %v193_v5 }
  0x3d   :  { %122 = vmatpush.bf16.xpose.msra.mxu0 %v192_v6 }
  0x45   :  { %123 = vmatpush.bf16.xpose.msra.mxu0 %v191_v7 }
  0x4c   :  { %124 = vmatmul.bf16.vlgmr.msra.gmra.mxu0 %v190_v8 }
  0xc9   :  { %v125_v9 = vpop.f32.mrf.mxu0 }
  0xd1   :  { %v127_v10 = vpop.f32.mrf.mxu0 }
  0xd2   :  { %v202_v11 = vpack.c.bf16 %v127_v10, %v125_v9 }
  0xd4   :  { %203 = vst [vmem:[#allocation7] sm:$0xff] %v202_v11  }
  0xd5   :  { %146 = dma.vmem_to_hbm [thread:$0]  %s139_s1, 128, %s141_s23, [#allocation4], %s288_s17, %s288_s17, %s289_s18  }
  0xd6   :  { %285 = dma.done.wait [#allocation4], 128  }
  0xd7   :  { %286 = vsyncadd [#allocation4], 4294967168 }
  0xd8   :  { %151 = vsyncpa [#allocation3], 1 }
  0xd9   :  { %152 = vsyncpa [#allocation6], 1 }
  0xda   :  { %153 = vsyncpa [#allocation4], 1 }

</bundles_post_ra>
